<compile_context>
chip_gen: v5e
topology: v5e:2x2
jax: 0.10.0
libtpu: 0.0.40
codegen_flags: <defaults>
</compile_context>

<pallas_src>
import math

import jax
import jax.numpy as jnp
from jax.experimental import pallas as pl
from jax.experimental.pallas import tpu as pltpu

# Below this many bytes the Pallas copy path is skipped even when requested:
# launch + DMA-setup overhead (microsecond scale) dwarfs a small copy.
_MIN_PALLAS_BYTES = 4 << 20   # 4 MiB

# Candidate lane widths for the flat 2-D slab handed to the copy kernel
# (widest first: longer contiguous DMA rows; all (8,128)-friendly).
_LANE_CANDIDATES = (1024, 512, 256, 128)


def _dma_copy_kernel(x_hbm, o_hbm, sem):
    # Single HBM -> HBM DMA; no VMEM staging, no grid, no vector compute.
    cp = pltpu.make_async_copy(x_hbm, o_hbm, sem)
    cp.start()
    cp.wait()


def _pallas_hbm_copy(flat2d):
    """Physical copy of a (rows, lanes) f32 slab via one HBM->HBM DMA.

    No input_output_aliases: the output is a fresh HBM buffer, so the call
    moves exactly 2 * nbytes over HBM (1 read + 1 write).  Only meaningful for
    benchmarking — a .view carries no data-movement semantics.
    """
    nbytes = flat2d.size * jnp.dtype(flat2d.dtype).itemsize
    cost = pl.CostEstimate(flops=0, transcendentals=0, bytes_accessed=2 * nbytes)
    return pl.pallas_call(
        _dma_copy_kernel,
        out_shape=jax.ShapeDtypeStruct(flat2d.shape, flat2d.dtype),
        in_specs=[pl.BlockSpec(memory_space=pl.ANY)],
        out_specs=pl.BlockSpec(memory_space=pl.ANY),
        scratch_shapes=[pltpu.SemaphoreType.DMA(())],
        cost_estimate=cost,
    )(flat2d)


def _flatten_lane_dense(x):
    """Flatten x to a lane-dense (rows, lanes) 2-D f32 slab, or None if no fit."""
    if x.dtype != jnp.float32:
        # TODO(synk): sub-32-bit dtypes could also be DMA-copied (it is just
        # bytes), but the free jnp.reshape path already covers them.
        return None
    total = x.size
    for lanes in _LANE_CANDIDATES:
        if total % lanes == 0 and (total // lanes) % 8 == 0:
            return jnp.reshape(x, (total // lanes, lanes))
    return None


def _resolve_view_shape(shape, total):
    """torch .view shape semantics: at most one -1, sizes must multiply out."""
    shape = tuple(int(s) for s in shape)
    if shape.count(-1) > 1:
        raise ValueError("only one dimension may be -1 in a view shape")
    if -1 in shape:
        known = math.prod(s for s in shape if s != -1)
        if known <= 0 or total % known != 0:
            raise ValueError(f"cannot view {total} elements as {shape}")
        shape = tuple(total // known if s == -1 else s for s in shape)
    if math.prod(shape) != total:
        raise ValueError(f"cannot view {total} elements as {shape}")
    return shape


class InvertibleViewPallas:
    """JAX/Pallas equivalent of invertnn's InvertibleView.

    Default (`use_pallas_copy=False`) is a pure metadata jnp.reshape — the true
    optimum on every TPU generation.  `use_pallas_copy=True` routes tensors of
    at least `min_pallas_bytes` through a single HBM->HBM Pallas DMA copy for
    benchmarking parity.
    """

    def __init__(self, input_shape, output_shape, use_pallas_copy=False,
                 min_pallas_bytes=_MIN_PALLAS_BYTES):
        self.input_shape = tuple(int(s) for s in input_shape)
        self.output_shape = tuple(int(s) for s in output_shape)
        self.use_pallas_copy = use_pallas_copy
        self.min_pallas_bytes = int(min_pallas_bytes)
        if -1 not in self.input_shape and -1 not in self.output_shape:
            if math.prod(self.input_shape) != math.prod(self.output_shape):
                raise ValueError(
                    f"input_shape {self.input_shape} and output_shape "
                    f"{self.output_shape} have different element counts")

    def _view(self, x, target_shape):
        target_shape = _resolve_view_shape(target_shape, x.size)
        if not self.use_pallas_copy:
            # A .view is metadata-only; this is the zero-cost path.
            return jnp.reshape(x, target_shape)
        nbytes = x.size * jnp.dtype(x.dtype).itemsize
        if nbytes < self.min_pallas_bytes:
            return jnp.reshape(x, target_shape)
        flat = _flatten_lane_dense(x)
        if flat is None:
            return jnp.reshape(x, target_shape)
        flat = _pallas_hbm_copy(flat)
        return jnp.reshape(flat, target_shape)

    def forward(self, x):
        # torch: input.view(self.output_shape)
        return self._view(x, self.output_shape)

    def invert(self, y):
        # torch: output.view(self.input_shape)
        return self._view(y, self.input_shape)

    def inv_jacobian_logabsdet(self, y):
        # Volume-preserving mixin: returns (inverted, ones((batch, 1))),
        # faithfully matching the PyTorch reference.  (Mathematically the
        # log|det J| of a view is zero; ones is kept for reference parity.)
        return self.invert(y), jnp.ones((y.shape[0], 1), dtype=y.dtype)


if __name__ == "__main__":
    key = jax.random.PRNGKey(0)
    input_shape = (2, 4, 16, 16)          # NCHW
    output_shape = (2, 4 * 16 * 16)       # flatten per-sample

    x = jax.random.normal(key, input_shape, dtype=jnp.float32)

    # Default configuration: pure metadata reshape (the true optimum).
    mod = InvertibleViewPallas(input_shape, output_shape)
    y = mod.forward(x)
    jax.block_until_ready(y)
    x_back = mod.invert(y)
    jax.block_until_ready(x_back)
    logdet_inv, ladj = mod.inv_jacobian_logabsdet(y)
    jax.block_until_ready(ladj)

    assert y.shape == output_shape
    assert x_back.shape == input_shape
    assert jnp.array_equal(y, jnp.reshape(x, output_shape))
    assert jnp.array_equal(x_back, x)
    assert jnp.array_equal(logdet_inv, x)
    assert ladj.shape == (input_shape[0], 1)

    # Benchmark-parity configuration: force the Pallas HBM->HBM DMA copy even
    # at this small (8 KiB) size by dropping the size threshold, so the kernel
    # path is exercised at least once.
    mod_copy = InvertibleViewPallas(input_shape, output_shape,
                                    use_pallas_copy=True, min_pallas_bytes=0)
    y_copy = mod_copy.forward(x)
    jax.block_until_ready(y_copy)
    x_copy_back = mod_copy.invert(y_copy)
    jax.block_until_ready(x_copy_back)
    assert jnp.array_equal(y_copy, y)
    assert jnp.array_equal(x_copy_back, x)

    print("KERNEL_OK")
</pallas_src>

<mosaic_0001>
module attributes {stable_mosaic.version = 11 : i64} {
  func.func @_dma_copy_kernel(%arg0: memref<8x256xf32, #tpu.memory_space<any>>, %arg1: memref<8x256xf32, #tpu.memory_space<any>>, %arg2: memref<!tpu.dma_semaphore, #tpu.memory_space<semaphore_mem>>) attributes {dimension_semantics = [], scalar_prefetch = 0 : i64, scratch_operands = 1 : i64, tpu.core_type = #tpu.core_type<tc>} {
    tpu.enqueue_dma source(%arg0 : memref<8x256xf32, #tpu.memory_space<any>>) target(%arg1 : memref<8x256xf32, #tpu.memory_space<any>>) target_semaphore(%arg2 : memref<!tpu.dma_semaphore, #tpu.memory_space<semaphore_mem>>)
    tpu.wait_dma2 semaphore(%arg2 : memref<!tpu.dma_semaphore, #tpu.memory_space<semaphore_mem>>) src(%arg0 : memref<8x256xf32, #tpu.memory_space<any>>) dst(%arg1 : memref<8x256xf32, #tpu.memory_space<any>>)
    return
  }
}

</mosaic_0001>

<bundles_post_ra>
// kernel: tpu_custom_call.1
= control target key start
LH: loop header
LB: loop body
LE: loop exit
PB: predicated region body
PF: predicated region fallthrough
CT: control target
= control target key end

     0   :  { %s33_s12 = smov [#allocation2]   ;;  %s34_s13 = smov [#allocation3]   ;;  %s52_s0 = inlined_call_operand.hbm [shape: f32[8,256], index: 0, kind: input, shape index: {}]   ;;  %s53_s1 = inlined_call_operand.hbm [shape: f32[8,256], index: 1, kind: output, shape index: {}]  }
   0x1   :  { %s10_s8 = sshll.u32 %s52_s0, 4  ;;  %s12_s11 = sshll.u32 %s53_s1, 4  ;;  %s11_s8 = int_to_ptr.hbm [resolvable:$true] %s10_s8  ;;  %s13_s11 = int_to_ptr.hbm [resolvable:$true] %s12_s11 }
   0x2   :  { %s35_s14 = smov 0  }
   0x3   :  { %16 = dma.general %s11_s8, 256, %s13_s11, %s33_s12, %s34_s13, [#allocation4], %s35_s14, 0  }
   0x4   :  { %31 = dma.done.wait [#allocation2], 256 }
   0x5   :  { %32 = vsyncadd [#allocation2], 4294967040 }
   0x6   :  { %21 = vsyncmov [#allocation2] }
   0x9   :  { %s22_s15 = vpop.sfrf %21 }
   0xa   :  { %p27_p0 = scmp.ne.s32.totalorder %s22_s15, 0 }
   0xc   :  { %26 = shalt.err (%p27_p0)  }

</bundles_post_ra>
